<compile_context>
chip_gen: v6e
topology: v6e:2x2x1
jax: 0.10.0
libtpu: 0.0.40
codegen_flags: <defaults>
</compile_context>

<pallas_src>
import jax
import jax.numpy as jnp
from jax.experimental import pallas as pl
from jax.experimental.pallas import tpu as pltpu


def _round_up(v: int, m: int) -> int:
    return ((v + m - 1) // m) * m


def _compose_kernel(x_ref, w1_ref, b1_ref, w2_ref, b2_ref, h_ref, y_ref):
    # first(x): h = x @ W1 + b1   (stored -> CustomCompose.first_out)
    h = jnp.dot(x_ref[...], w1_ref[...], preferred_element_type=jnp.float32) + b1_ref[...]
    h_ref[...] = h.astype(h_ref.dtype)
    # second(h): y = h @ W2 + b2  (h consumed in-register; never re-read from HBM)
    y = jnp.dot(h.astype(w2_ref.dtype), w2_ref[...],
                preferred_element_type=jnp.float32) + b2_ref[...]
    y_ref[...] = y.astype(y_ref.dtype)


def compose_forward(x, w1, b1, w2, b2, *, tile_n: int = 1024, min_pallas_rows: int = 256):
    """Fused forward of `first` then `second`, returning (first_out, second_out)."""
    n, f_in = x.shape
    f_hid = w1.shape[1]
    f_out = w2.shape[1]
    dtype = x.dtype
    itemsize = jnp.dtype(dtype).itemsize

    # Tiny-N fallback: pallas_call launch + pipeline warm-up dominates a handful of
    # rows; XLA fuses two small dots trivially.
    if n < min_pallas_rows:
        h = x @ w1 + b1
        y = h @ w2 + b2
        return h, y

    # Row tile: large (amortizes ~0.35 us/step pipeline overhead), multiple of 8, and
    # chosen so the number of row tiles is even -> balanced across v7x's 2 TCs.
    tile_pairs = max(1, -(-n // (2 * tile_n)))            # ceil(n / (2*tile_n))
    tn = _round_up(-(-n // (2 * tile_pairs)), 8)          # round_up(cdiv(n, 2*pairs), 8)
    tn = min(tn, _round_up(n, 8))
    grid = (pl.cdiv(n, tn),)

    # VMEM budget: account for Mosaic's internal lane padding of small feature dims
    # (budget only — HBM arrays stay unpadded). Double-buffered x/h/y row tiles +
    # (conservatively double-buffered) resident weights/biases, 1.5x headroom,
    # capped at 40 MiB so a v5e/v6e-tuned config cannot overshoot v7x's 64 MiB VMEM.
    f_in_v, f_hid_v, f_out_v = (_round_up(d, 128) for d in (f_in, f_hid, f_out))
    tile_bytes = 2 * tn * (f_in_v + f_hid_v + f_out_v) * itemsize
    weight_bytes = 2 * (f_in_v * f_hid_v + f_hid_v * f_out_v
                        + 8 * (f_hid_v + f_out_v)) * itemsize
    vmem_bytes = min(40 * 1024 * 1024,
                     max(16 * 1024 * 1024, int(1.5 * (tile_bytes + weight_bytes))))

    h, y = pl.pallas_call(
        _compose_kernel,
        out_shape=(
            jax.ShapeDtypeStruct((n, f_hid), dtype),
            jax.ShapeDtypeStruct((n, f_out), dtype),
        ),
        grid_spec=pltpu.PrefetchScalarGridSpec(
            num_scalar_prefetch=0,
            grid=grid,
            in_specs=[
                pl.BlockSpec((tn, f_in), lambda i: (i, 0)),      # x: row tiles (real shape)
                pl.BlockSpec((f_in, f_hid), lambda i: (0, 0)),   # W1: VMEM-resident
                pl.BlockSpec((1, f_hid), lambda i: (0, 0)),      # b1: VMEM-resident
                pl.BlockSpec((f_hid, f_out), lambda i: (0, 0)),  # W2: VMEM-resident
                pl.BlockSpec((1, f_out), lambda i: (0, 0)),      # b2: VMEM-resident
            ],
            out_specs=(
                pl.BlockSpec((tn, f_hid), lambda i: (i, 0)),     # h (first_out)
                pl.BlockSpec((tn, f_out), lambda i: (i, 0)),     # y (second_out)
            ),
        ),
        compiler_params=pltpu.CompilerParams(
            dimension_semantics=("parallel",),   # shard row tiles over v7x's 2 TCs
            vmem_limit_bytes=vmem_bytes,
        ),
    )(x, w1, b1, w2, b2)

    return h, y


class CustomCompose:
    """JAX/Pallas mirror of the PyTorch CustomCompose: applies `first` then `second`
    sequentially, storing intermediate outputs in .first_out / .second_out."""

    def __init__(self, w1, b1, w2, b2, *, min_pallas_rows: int = 256):
        self.w1, self.b1, self.w2, self.b2 = w1, b1, w2, b2
        self.min_pallas_rows = min_pallas_rows
        self.first_out = None
        self.second_out = None

    def __call__(self, x):
        h, y = compose_forward(x, self.w1, self.b1, self.w2, self.b2,
                               min_pallas_rows=self.min_pallas_rows)
        self.first_out = h    # == first(x)          (clone of intermediate)
        self.second_out = y   # == second(first(x))  (clone of final output)
        return y


if __name__ == "__main__":
    # small shapes consistent with the module: seq N=8, F_in=32, F_hid=64, F_out=32
    N, F_IN, F_HID, F_OUT = 8, 32, 64, 32
    key = jax.random.PRNGKey(0)
    kx, k1, kb1, k2, kb2 = jax.random.split(key, 5)

    x = jax.random.normal(kx, (N, F_IN), dtype=jnp.float32)
    w1 = jax.random.normal(k1, (F_IN, F_HID), dtype=jnp.float32) * 0.1
    b1 = jax.random.normal(kb1, (1, F_HID), dtype=jnp.float32) * 0.1
    w2 = jax.random.normal(k2, (F_HID, F_OUT), dtype=jnp.float32) * 0.1
    b2 = jax.random.normal(kb2, (1, F_OUT), dtype=jnp.float32) * 0.1

    # Force the Pallas path even at tiny N so the kernel itself is exercised.
    model = CustomCompose(w1, b1, w2, b2, min_pallas_rows=0)
    y = model(x)
    jax.block_until_ready(y)
    jax.block_until_ready(model.first_out)

    # reference check (plain JAX)
    h_ref = x @ w1 + b1
    y_ref = h_ref @ w2 + b2
    assert jnp.allclose(model.first_out, h_ref, atol=1e-4, rtol=1e-4)
    assert jnp.allclose(y, y_ref, atol=1e-4, rtol=1e-4)

    # multi-tile row dimension (even tile count -> balanced on v7x)
    N2 = 1536
    x2 = jax.random.normal(kx, (N2, F_IN), dtype=jnp.float32)
    h2, y2 = compose_forward(x2, w1, b1, w2, b2)
    jax.block_until_ready(y2)
    h2_ref = x2 @ w1 + b1
    y2_ref = h2_ref @ w2 + b2
    assert jnp.allclose(h2, h2_ref, atol=1e-4, rtol=1e-4)
    assert jnp.allclose(y2, y2_ref, atol=1e-4, rtol=1e-4)

    # tiny-N XLA fallback path (default threshold) matches as well
    h3, y3 = compose_forward(x, w1, b1, w2, b2)
    jax.block_until_ready(y3)
    assert jnp.allclose(h3, h_ref, atol=1e-4, rtol=1e-4)
    assert jnp.allclose(y3, y_ref, atol=1e-4, rtol=1e-4)

    print("KERNEL_OK")
</pallas_src>

<mosaic_0001>
module attributes {stable_mosaic.version = 11 : i64} {
  func.func @_compose_kernel(%arg0: i32, %arg1: memref<8x32xf32, #tpu.memory_space<vmem>>, %arg2: memref<32x64xf32, #tpu.memory_space<vmem>>, %arg3: memref<1x64xf32, #tpu.memory_space<vmem>>, %arg4: memref<64x32xf32, #tpu.memory_space<vmem>>, %arg5: memref<1x32xf32, #tpu.memory_space<vmem>>, %arg6: memref<8x64xf32, #tpu.memory_space<vmem>>, %arg7: memref<8x32xf32, #tpu.memory_space<vmem>>) attributes {dimension_semantics = [#tpu.dimension_semantics<parallel>], iteration_bounds = array<i64: 1>, scalar_prefetch = 0 : i64, scratch_operands = 0 : i64, tpu.core_type = #tpu.core_type<tc>, window_params = [{transform_indices = @transform_0, window_bounds = array<i64: 8, 32>}, {pipeline_mode = #tpu.pipeline_mode<synchronous>, transform_indices = @transform_1, window_bounds = array<i64: 32, 64>}, {pipeline_mode = #tpu.pipeline_mode<synchronous>, transform_indices = @transform_2, window_bounds = array<i64: 1, 64>}, {pipeline_mode = #tpu.pipeline_mode<synchronous>, transform_indices = @transform_3, window_bounds = array<i64: 64, 32>}, {pipeline_mode = #tpu.pipeline_mode<synchronous>, transform_indices = @transform_4, window_bounds = array<i64: 1, 32>}, {transform_indices = @transform_5, window_bounds = array<i64: 8, 64>}, {transform_indices = @transform_6, window_bounds = array<i64: 8, 32>}]} {
    %c0 = arith.constant 0 : index
    %c0_0 = arith.constant 0 : index
    %0 = vector.load %arg1[%c0, %c0_0] : memref<8x32xf32, #tpu.memory_space<vmem>>, vector<8x32xf32>
    %c0_1 = arith.constant 0 : index
    %c0_2 = arith.constant 0 : index
    %1 = vector.load %arg2[%c0_1, %c0_2] : memref<32x64xf32, #tpu.memory_space<vmem>>, vector<32x64xf32>
    %cst = arith.constant dense<0.000000e+00> : vector<8x64xf32>
    %2 = tpu.matmul %0, %1, %cst {dimension_numbers = #tpu.dot_dimension_numbers<[1], [0], [0], [1], [0, 0, 1, 1], [], []>} : vector<8x32xf32>, vector<32x64xf32>, vector<8x64xf32> -> vector<8x64xf32>
    %c0_3 = arith.constant 0 : index
    %c0_4 = arith.constant 0 : index
    %3 = vector.load %arg3[%c0_3, %c0_4] : memref<1x64xf32, #tpu.memory_space<vmem>>, vector<1x64xf32>
    %4 = vector.broadcast %3 : vector<1x64xf32> to vector<8x64xf32>
    %5 = arith.addf %2, %4 : vector<8x64xf32>
    %c0_5 = arith.constant 0 : index
    %c0_6 = arith.constant 0 : index
    %6 = vector.load %arg6[%c0_5, %c0_6] : memref<8x64xf32, #tpu.memory_space<vmem>>, vector<8x64xf32>
    tpu.vector_store %arg6[%c0_5, %c0_6], %5 {strides = array<i32>} : memref<8x64xf32, #tpu.memory_space<vmem>>, vector<8x64xf32>,
    %c0_7 = arith.constant 0 : index
    %c0_8 = arith.constant 0 : index
    %7 = vector.load %arg4[%c0_7, %c0_8] : memref<64x32xf32, #tpu.memory_space<vmem>>, vector<64x32xf32>
    %cst_9 = arith.constant dense<0.000000e+00> : vector<8x32xf32>
    %8 = tpu.matmul %5, %7, %cst_9 {dimension_numbers = #tpu.dot_dimension_numbers<[1], [0], [0], [1], [0, 0, 1, 1], [], []>} : vector<8x64xf32>, vector<64x32xf32>, vector<8x32xf32> -> vector<8x32xf32>
    %c0_10 = arith.constant 0 : index
    %c0_11 = arith.constant 0 : index
    %9 = vector.load %arg5[%c0_10, %c0_11] : memref<1x32xf32, #tpu.memory_space<vmem>>, vector<1x32xf32>
    %10 = vector.broadcast %9 : vector<1x32xf32> to vector<8x32xf32>
    %11 = arith.addf %8, %10 : vector<8x32xf32>
    %c0_12 = arith.constant 0 : index
    %c0_13 = arith.constant 0 : index
    %12 = vector.load %arg7[%c0_12, %c0_13] : memref<8x32xf32, #tpu.memory_space<vmem>>, vector<8x32xf32>
    tpu.vector_store %arg7[%c0_12, %c0_13], %11 {strides = array<i32>} : memref<8x32xf32, #tpu.memory_space<vmem>>, vector<8x32xf32>,
    return
  }
  func.func @transform_0(%arg0: i32) -> (i32, i32) {
    %c0_i32 = arith.constant 0 : i32
    %c0_i32_0 = arith.constant 0 : i32
    return %arg0, %c0_i32 : i32, i32
  }
  func.func @transform_1(%arg0: i32) -> (i32, i32) {
    %c0_i32 = arith.constant 0 : i32
    %c0_i32_0 = arith.constant 0 : i32
    %c0_i32_1 = arith.constant 0 : i32
    return %c0_i32, %c0_i32_0 : i32, i32
  }
  func.func @transform_2(%arg0: i32) -> (i32, i32) {
    %c0_i32 = arith.constant 0 : i32
    %c0_i32_0 = arith.constant 0 : i32
    %c0_i32_1 = arith.constant 0 : i32
    return %c0_i32, %c0_i32_0 : i32, i32
  }
  func.func @transform_3(%arg0: i32) -> (i32, i32) {
    %c0_i32 = arith.constant 0 : i32
    %c0_i32_0 = arith.constant 0 : i32
    %c0_i32_1 = arith.constant 0 : i32
    return %c0_i32, %c0_i32_0 : i32, i32
  }
  func.func @transform_4(%arg0: i32) -> (i32, i32) {
    %c0_i32 = arith.constant 0 : i32
    %c0_i32_0 = arith.constant 0 : i32
    %c0_i32_1 = arith.constant 0 : i32
    return %c0_i32, %c0_i32_0 : i32, i32
  }
  func.func @transform_5(%arg0: i32) -> (i32, i32) {
    %c0_i32 = arith.constant 0 : i32
    %c0_i32_0 = arith.constant 0 : i32
    return %arg0, %c0_i32 : i32, i32
  }
  func.func @transform_6(%arg0: i32) -> (i32, i32) {
    %c0_i32 = arith.constant 0 : i32
    %c0_i32_0 = arith.constant 0 : i32
    return %arg0, %c0_i32 : i32, i32
  }
}

</mosaic_0001>

<bundles_post_ra>
// kernel: tpu_custom_call.1
= control target key start
LH: loop header
LB: loop body
LE: loop exit
PB: predicated region body
PF: predicated region fallthrough
CT: control target
= control target key end

     0   :  { %12 = vsyncpa [#allocation3], 0  ;;  %v325_v1 = vmov 0.0   ;;  %vm326_vm0 = vmmov 0   ;;  %s419_s0 = inlined_call_operand.vmem [shape: f32[8,32], index: 0, kind: input, shape index: {}]   ;;  %s420_s1 = inlined_call_operand.vmem [shape: f32[32,64], index: 1, kind: input, shape index: {}]   ;;  %s421_s2 = inlined_call_operand.vmem [shape: f32[1,64], index: 2, kind: input, shape index: {}]   ;;  %s422_s3 = inlined_call_operand.vmem [shape: f32[64,32], index: 3, kind: input, shape index: {}]   ;;  %s423_s4 = inlined_call_operand.vmem [shape: f32[1,32], index: 4, kind: input, shape index: {}]   ;;  %s424_s5 = inlined_call_operand.hbm [shape: f32[8,64], index: 5, kind: output, shape index: {0}]   ;;  %s425_s6 = inlined_call_operand.hbm [shape: f32[8,32], index: 6, kind: output, shape index: {1}]  }
   0x1   :  { %v28_v0 = vld [vmem:[%s420_s1 + $0x18] sm:$0xff]  ;;  %247 = vmatprep.subr.mxu0 %v325_v1  ;;  %v27_v2 = vld [vmem:[%s420_s1 + $0x10] sm:$0xff]  ;;  %255 = vmatprep.mubr.msk.f32.mxu0 %vm326_vm0, %v325_v1  ;;  %v26_v5 = vld [vmem:[%s420_s1 + $0x8] sm:$0xff] }
   0x2   :  { %v119_v3 = vld [vmem:[%s422_s3 + $0x38] sm:$0xff]  ;;  %248 = vmatpush3.msra.mxu0 %v28_v0  ;;  %258 = vmatprep.subr.mxu1 %v325_v1  ;;  %v118_v4 = vld [vmem:[%s422_s3 + $0x30] sm:$0xff]  ;;  %v117_v6 = vld [vmem:[%s422_s3 + $0x28] sm:$0xff] }
   0x3   :  { %249 = vmatprep.subr.mxu0 %v325_v1  ;;  %259 = vmatpush3.msra.mxu1 %v119_v3 }
   0x4   :  { %250 = vmatpush3.msra.mxu0 %v27_v2  ;;  %260 = vmatprep.subr.mxu1 %v325_v1 }
   0x5   :  { %13 = vsyncpa [#allocation5], 0  ;;  %251 = vmatprep.subr.mxu0 %v325_v1  ;;  %v25_v7 = vld [vmem:[%s420_s1] sm:$0xff]  ;;  %261 = vmatpush3.msra.mxu1 %v118_v4  ;;  %vm36_vm1 = vcmask 261120   ;;  %v115_v10 = vld [vmem:[%s422_s3 + $0x18] sm:$0xff]  ;;  %vm110_vm2 = vcmask 523264  }
   0x6   :  { %252 = vmatpush3.msra.mxu0 %v26_v5  ;;  %v24_v8 = vld [vmem:[%s419_s0] sm:$0xff]  ;;  %262 = vmatprep.subr.mxu1 %v325_v1  ;;  %v114_v11 = vld [vmem:[%s422_s3 + $0x10] sm:$0xff]  ;;  %v113_v12 = vld [vmem:[%s422_s3 + $0x8] sm:$0xff]  ;;  %s327_s23 = smov [#allocation2]  }
   0x7   :  { %v116_v9 = vld [vmem:[%s422_s3 + $0x20] sm:$0xff]  ;;  %253 = vmatprep.subr.mxu0 %v325_v1  ;;  %263 = vmatpush3.msra.mxu1 %v117_v6  ;;  %s207_s24 = sshll.u32 %s327_s23, 4  ;;  %s208_s24 = int_to_ptr.vmem [resolvable:$true] %s207_s24 }
   0x8   :  { %254 = vmatpush3.msra.mxu0 %v25_v7  ;;  %264 = vmatprep.subr.mxu1 %v325_v1  ;;  %v112_v13 = vld [vmem:[%s422_s3] sm:$0xff]  ;;  %s281_s25 = scalar_lea.vmem %s208_s24, 128  ;;  %p286_p1 = scmp.lt.s32.totalorder %s208_s24, %s208_s24 }
   0x9   :  { %256 = vmatmul.mubr.msk.f32.vlgmr.msra.gmra.mxu0 %vm36_vm1, %v24_v8  ;;  %265 = vmatpush3.msra.mxu1 %v116_v9  ;;  %v229_v14 = vld [vmem:[%s421_s2] ss:$0 sm:$0xff]  ;;  %p282_p0 = scmp.ne.s32.totalorder %s208_s24, %s281_s25  ;;  %p287_p2 = scmp.lt.s32.totalorder %s281_s25, %s281_s25 }
   0xa   :  { %266 = vmatprep.subr.mxu1 %v325_v1  ;;  %274 = vmatprep.mubr.msk.f32.mxu1 %vm326_vm0, %v325_v1 }
   0xb   :  { %267 = vmatpush3.msra.mxu1 %v115_v10  ;;  %p288_p3 = por %p287_p2, %p286_p1 }
   0xc   :  { %268 = vmatprep.subr.mxu1 %v325_v1 }
   0xd   :  { %269 = vmatpush3.msra.mxu1 %v114_v11  ;;  %p289_p4 = pnand %p288_p3, %p282_p0 }
   0xe   :  { %270 = vmatprep.subr.mxu1 %v325_v1 }
   0xf   :  { %271 = vmatpush3.msra.mxu1 %v113_v12 }
  0x10   :  { %272 = vmatprep.subr.mxu1 %v325_v1 }
  0x11   :  { %273 = vmatpush3.msra.mxu1 %v112_v13 }
  0xc9   :  { %v106_v15 = vpop.f32.mrf.mxu0 }
  0xca   :  { %v107_v16 = vadd.f32 %v229_v14, %v106_v15 }
  0xcb   :  { %v257_v17 = vpop.f32.mrf.mxu0 }
  0xcc   :  { %275 = vmatmul.mubr.msk.f32.vlgmr.msra.gmra.mxu1 %vm110_vm2, %v107_v16  ;;  %111 = vst.msk [vmem:[#allocation2] sm:$0xff] %vm110_vm2, %v107_v16 }
  0xcd   :  { %292 = shalt.err (!%p289_p4)
}
  0xce   :  { %210 = dma.vmem_to_hbm [thread:$0]  %s208_s24, 128, %s424_s5, [#allocation3]   ;;  %v231_v18 = vld [vmem:[%s423_s4] ss:$0 sm:$0xff] }
  0xcf   :  { %s328_s28 = smov [#allocation4]  }
  0xd0   :  { %s217_s29 = sshll.u32 %s328_s28, 4  ;;  %s218_s29 = int_to_ptr.vmem [resolvable:$true] %s217_s29 }
  0xd1   :  { %s301_s30 = scalar_lea.vmem %s218_s29, 128  ;;  %p306_p6 = scmp.lt.s32.totalorder %s218_s29, %s218_s29 }
  0xd2   :  { %p302_p5 = scmp.ne.s32.totalorder %s218_s29, %s301_s30  ;;  %p307_p7 = scmp.lt.s32.totalorder %s301_s30, %s301_s30 }
  0xd4   :  { %p308_p8 = por %p307_p7, %p306_p6 }
  0xd6   :  { %p309_p9 = pnand %p308_p8, %p302_p5 }
 0x18c   :  { %v196_v19 = vpop.f32.mrf.mxu1 }
 0x18d   :  { %v197_v20 = vadd.f32 %v231_v18, %v196_v19 }
 0x18e   :  { %v276_v21 = vpop.f32.mrf.mxu1 }
 0x18f   :  { %200 = vst.msk [vmem:[#allocation4] sm:$0xff] %vm36_vm1, %v197_v20 }
 0x190   :  { %312 = shalt.err (!%p309_p9)
}
 0x191   :  { %220 = dma.vmem_to_hbm [thread:$0]  %s218_s29, 128, %s425_s6, [#allocation5]  }
 0x192   :  { %321 = dma.done.wait [#allocation3], 128  }
 0x193   :  { %322 = vsyncadd [#allocation3], 4294967168 }
 0x194   :  { %323 = dma.done.wait [#allocation5], 128  }
 0x195   :  { %324 = vsyncadd [#allocation5], 4294967168 }
 0x196   :  { %227 = vsyncpa [#allocation3], 1 }
 0x197   :  { %228 = vsyncpa [#allocation5], 1 }

</bundles_post_ra>
